<compile_context>
chip_gen: v7x
topology: tpu7x:2x2x1
jax: 0.10.0
libtpu: 0.0.40
codegen_flags: <defaults>
</compile_context>

<pallas_src>
import functools

import jax
import jax.numpy as jnp
from jax.experimental import pallas as pl
from jax.experimental.pallas import tpu as pltpu

BN_EPS = 1e-5
NEG_SLOPE = 0.2        # nn.LeakyReLU(0.2)


# --------------------------------------------------------------------------- #
# Fused per-sample kernel: conv1..conv6 + BN (folded) + LeakyReLU + sigmoid.
# --------------------------------------------------------------------------- #
def _disc_kernel(xp_ref, s2_ref, s3_ref,
                 w1_ref, b1_ref,
                 w2_ref, b2_ref, bn1s_ref, bn1b_ref,
                 w3_ref, b3_ref, bn2s_ref, bn2b_ref,
                 w4_ref, b4_ref, bn3s_ref, bn3b_ref,
                 w5_ref, b5_ref, bn4s_ref, bn4b_ref,
                 w6_ref, b6_ref,
                 out_ref, *, k2, k3):
    def dot(a, b):
        return jnp.dot(a, b, preferred_element_type=jnp.float32)

    def lrelu(v):
        # LeakyReLU(0.2) == max(x, 0.2 * x)
        return jnp.maximum(v, NEG_SLOPE * v)

    # conv1 (kernel = stride = k1) as im2col matmul, then LeakyReLU.
    h = lrelu(dot(xp_ref[...], w1_ref[...]) + b1_ref[...])               # (T1, 32)

    # conv2 (kernel = stride = k2):  sum_j (S2_j @ h) @ W2_j  -> BN1 -> LeakyReLU
    acc = dot(dot(s2_ref[0], h), w2_ref[0])
    for j in range(1, k2):
        acc = acc + dot(dot(s2_ref[j], h), w2_ref[j])
    h = lrelu((acc + b2_ref[...]) * bn1s_ref[...] + bn1b_ref[...])       # (T2, 32)

    # conv3 (kernel = stride = k3) -> BN2 -> LeakyReLU
    acc = dot(dot(s3_ref[0], h), w3_ref[0])
    for j in range(1, k3):
        acc = acc + dot(dot(s3_ref[j], h), w3_ref[j])
    h = lrelu((acc + b3_ref[...]) * bn2s_ref[...] + bn2b_ref[...])       # (T3, 64)

    # conv4..conv6 are 1x1 convs == plain matmuls along the feature axis.
    h = lrelu((dot(h, w4_ref[...]) + b4_ref[...]) * bn3s_ref[...] + bn3b_ref[...])  # (T3, 128)
    h = lrelu((dot(h, w5_ref[...]) + b5_ref[...]) * bn4s_ref[...] + bn4b_ref[...])  # (T3, 32)

    logits = dot(h, w6_ref[...]) + b6_ref[...]                           # (T3, 16)
    out_ref[...] = 1.0 / (1.0 + jnp.exp(-logits))                        # sigmoid


# --------------------------------------------------------------------------- #
# Parameters (deterministic, synthetic), stored in PyTorch Conv1d layout
# (out_channels, in_channels, kernel).  BatchNorm is eval-mode (running stats).
# --------------------------------------------------------------------------- #
def init_params(key, channel, layer_seq):
    k1, k2, k3 = layer_seq
    ks = iter(jax.random.split(key, 40))

    def rnd(shape, scale=0.1):
        return (scale * jax.random.normal(next(ks), shape)).astype(jnp.float32)

    def bn(c):
        return {
            "gamma": 1.0 + rnd((c,)),
            "beta": rnd((c,)),
            "mean": rnd((c,)),
            "var": 1.0 + 0.5 * jnp.abs(rnd((c,), 1.0)),
        }

    return {
        "w1": rnd((32, channel, k1)), "b1": rnd((32,)),
        "w2": rnd((32, 32, k2)), "b2": rnd((32,)), "bn1": bn(32),
        "w3": rnd((64, 32, k3)), "b3": rnd((64,)), "bn2": bn(64),
        "w4": rnd((128, 64, 1)), "b4": rnd((128,)), "bn3": bn(128),
        "w5": rnd((32, 128, 1)), "b5": rnd((32,)), "bn4": bn(32),
        "w6": rnd((16, 32, 1)), "b6": rnd((16,)),
    }


# --------------------------------------------------------------------------- #
# Wrapper: one fused pallas_call, grid over batch ("parallel" for v7x megacore),
# weights held VMEM-resident via constant-index BlockSpecs.
# --------------------------------------------------------------------------- #
@functools.partial(jax.jit, static_argnums=(2,))
def discriminator_forward(x, params, layer_seq):
    B, C, L = x.shape
    k1, k2, k3 = layer_seq
    T1 = L // k1
    T2 = T1 // k2
    T3 = T2 // k3
    f32 = jnp.float32

    # -------- host-side (traced) pure-layout operand preparation --------
    # im2col for conv1: (B, T1, C*k1); column order (ci, j) matches w1 flatten.
    xp = x.reshape(B, C, T1, k1).transpose(0, 2, 1, 3).reshape(B, T1, C * k1)

    def gather_mats(k, t_out, t_in):
        # S[j, p, q] = 1  iff  q == p*k + j      (per-sample time gather)
        q = jnp.arange(t_in)[None, None, :]
        t = jnp.arange(t_out)[None, :, None]
        j = jnp.arange(k)[:, None, None]
        return (q == t * k + j).astype(f32)

    s2 = gather_mats(k2, T2, T1)            # (k2, T2, T1)
    s3 = gather_mats(k3, T3, T2)            # (k3, T3, T2)

    def bn_fold(p):
        scale = p["gamma"] * jax.lax.rsqrt(p["var"] + BN_EPS)
        shift = p["beta"] - p["mean"] * scale
        return scale[None, :], shift[None, :]

    def row(v):
        return v[None, :]

    w1m = params["w1"].reshape(32, C * k1).T                              # (C*k1, 32)
    w2m = jnp.stack([params["w2"][:, :, j].T for j in range(k2)])         # (k2, 32, 32)
    w3m = jnp.stack([params["w3"][:, :, j].T for j in range(k3)])         # (k3, 32, 64)
    w4m = params["w4"][:, :, 0].T                                         # (64, 128)
    w5m = params["w5"][:, :, 0].T                                         # (128, 32)
    w6m = params["w6"][:, :, 0].T                                         # (32, 16)
    bn1s, bn1b = bn_fold(params["bn1"])
    bn2s, bn2b = bn_fold(params["bn2"])
    bn3s, bn3b = bn_fold(params["bn3"])
    bn4s, bn4b = bn_fold(params["bn4"])

    operands = [
        xp, s2, s3,
        w1m, row(params["b1"]),
        w2m, row(params["b2"]), bn1s, bn1b,
        w3m, row(params["b3"]), bn2s, bn2b,
        w4m, row(params["b4"]), bn3s, bn3b,
        w5m, row(params["b5"]), bn4s, bn4b,
        w6m, row(params["b6"]),
    ]

    def const_spec(a):
        zeros = (0,) * a.ndim               # same block every grid step -> DMA'd once
        return pl.BlockSpec(a.shape, lambda bidx, _z=zeros: _z)

    in_specs = [pl.BlockSpec((None, T1, C * k1), lambda bidx: (bidx, 0, 0))]
    in_specs += [const_spec(a) for a in operands[1:]]

    out = pl.pallas_call(
        functools.partial(_disc_kernel, k2=k2, k3=k3),
        out_shape=jax.ShapeDtypeStruct((B, T3, 16), f32),
        grid_spec=pltpu.PrefetchScalarGridSpec(
            num_scalar_prefetch=0,
            grid=(B,),
            in_specs=in_specs,
            out_specs=pl.BlockSpec((None, T3, 16), lambda bidx: (bidx, 0, 0)),
        ),
        compiler_params=pltpu.CompilerParams(
            dimension_semantics=("parallel",)),
    )(*operands)

    # Feature-last (B, T3, 16)  ->  PyTorch Conv1d layout (B, 16, T3).
    return out.transpose(0, 2, 1)


# --------------------------------------------------------------------------- #
# Pure-JAX reference mirroring the PyTorch module (eval-mode BatchNorm).
# --------------------------------------------------------------------------- #
def reference_forward(x, params, layer_seq):
    k1, k2, k3 = layer_seq

    def conv1d(h, w, b_, stride):
        out = jax.lax.conv_general_dilated(
            h, w, window_strides=(stride,), padding="VALID",
            dimension_numbers=("NCH", "OIH", "NCH"))
        return out + b_[None, :, None]

    def bn(h, p):
        inv = jax.lax.rsqrt(p["var"] + BN_EPS)
        return ((h - p["mean"][None, :, None]) * inv[None, :, None]
                * p["gamma"][None, :, None] + p["beta"][None, :, None])

    def lrelu(v):
        return jnp.where(v >= 0, v, NEG_SLOPE * v)

    h = lrelu(conv1d(x, params["w1"], params["b1"], k1))
    h = lrelu(bn(conv1d(h, params["w2"], params["b2"], k2), params["bn1"]))
    h = lrelu(bn(conv1d(h, params["w3"], params["b3"], k3), params["bn2"]))
    h = lrelu(bn(conv1d(h, params["w4"], params["b4"], 1), params["bn3"]))
    h = lrelu(bn(conv1d(h, params["w5"], params["b5"], 1), params["bn4"]))
    return jax.nn.sigmoid(conv1d(h, params["w6"], params["b6"], 1))


if __name__ == "__main__":
    B, C, L = 2, 4, 16                      # batch, channels, sequence length
    layer_seq = (2, 2, 2)                   # kernel == stride for conv1..conv3
    x = jax.random.normal(jax.random.PRNGKey(0), (B, C, L), dtype=jnp.float32)
    params = init_params(jax.random.PRNGKey(1), C, layer_seq)

    out = discriminator_forward(x, params, layer_seq)
    out = jax.block_until_ready(out)
    T3 = L // (layer_seq[0] * layer_seq[1] * layer_seq[2])
    assert out.shape == (B, 16, T3), out.shape

    ref = reference_forward(x, params, layer_seq)
    if not jnp.allclose(out, ref, rtol=1e-2, atol=1e-2):
        max_err = float(jnp.max(jnp.abs(out - ref)))
        raise AssertionError(f"kernel/reference mismatch, max abs err = {max_err}")

    print("KERNEL_OK")
</pallas_src>

<mosaic_0001>
module attributes {stable_mosaic.version = 11 : i64} {
  func.func @_disc_kernel(%arg0: i32, %arg1: memref<1x8x8xf32, #tpu.memory_space<vmem>>, %arg2: memref<2x4x8xf32, #tpu.memory_space<vmem>>, %arg3: memref<2x2x4xf32, #tpu.memory_space<vmem>>, %arg4: memref<8x32xf32, #tpu.memory_space<vmem>>, %arg5: memref<1x32xf32, #tpu.memory_space<vmem>>, %arg6: memref<2x32x32xf32, #tpu.memory_space<vmem>>, %arg7: memref<1x32xf32, #tpu.memory_space<vmem>>, %arg8: memref<1x32xf32, #tpu.memory_space<vmem>>, %arg9: memref<1x32xf32, #tpu.memory_space<vmem>>, %arg10: memref<2x32x64xf32, #tpu.memory_space<vmem>>, %arg11: memref<1x64xf32, #tpu.memory_space<vmem>>, %arg12: memref<1x64xf32, #tpu.memory_space<vmem>>, %arg13: memref<1x64xf32, #tpu.memory_space<vmem>>, %arg14: memref<64x128xf32, #tpu.memory_space<vmem>>, %arg15: memref<1x128xf32, #tpu.memory_space<vmem>>, %arg16: memref<1x128xf32, #tpu.memory_space<vmem>>, %arg17: memref<1x128xf32, #tpu.memory_space<vmem>>, %arg18: memref<128x32xf32, #tpu.memory_space<vmem>>, %arg19: memref<1x32xf32, #tpu.memory_space<vmem>>, %arg20: memref<1x32xf32, #tpu.memory_space<vmem>>, %arg21: memref<1x32xf32, #tpu.memory_space<vmem>>, %arg22: memref<32x16xf32, #tpu.memory_space<vmem>>, %arg23: memref<1x16xf32, #tpu.memory_space<vmem>>, %arg24: memref<1x2x16xf32, #tpu.memory_space<vmem>>) attributes {dimension_semantics = [#tpu.dimension_semantics<parallel>], iteration_bounds = array<i64: 2>, scalar_prefetch = 0 : i64, scratch_operands = 0 : i64, tpu.core_type = #tpu.core_type<tc>, window_params = [{transform_indices = @transform_0, window_bounds = array<i64: 1, 8, 8>}, {pipeline_mode = #tpu.pipeline_mode<synchronous>, transform_indices = @transform_1, window_bounds = array<i64: 2, 4, 8>}, {pipeline_mode = #tpu.pipeline_mode<synchronous>, transform_indices = @transform_2, window_bounds = array<i64: 2, 2, 4>}, {pipeline_mode = #tpu.pipeline_mode<synchronous>, transform_indices = @transform_3, window_bounds = array<i64: 8, 32>}, {pipeline_mode = #tpu.pipeline_mode<synchronous>, transform_indices = @transform_4, window_bounds = array<i64: 1, 32>}, {pipeline_mode = #tpu.pipeline_mode<synchronous>, transform_indices = @transform_5, window_bounds = array<i64: 2, 32, 32>}, {pipeline_mode = #tpu.pipeline_mode<synchronous>, transform_indices = @transform_6, window_bounds = array<i64: 1, 32>}, {pipeline_mode = #tpu.pipeline_mode<synchronous>, transform_indices = @transform_7, window_bounds = array<i64: 1, 32>}, {pipeline_mode = #tpu.pipeline_mode<synchronous>, transform_indices = @transform_8, window_bounds = array<i64: 1, 32>}, {pipeline_mode = #tpu.pipeline_mode<synchronous>, transform_indices = @transform_9, window_bounds = array<i64: 2, 32, 64>}, {pipeline_mode = #tpu.pipeline_mode<synchronous>, transform_indices = @transform_10, window_bounds = array<i64: 1, 64>}, {pipeline_mode = #tpu.pipeline_mode<synchronous>, transform_indices = @transform_11, window_bounds = array<i64: 1, 64>}, {pipeline_mode = #tpu.pipeline_mode<synchronous>, transform_indices = @transform_12, window_bounds = array<i64: 1, 64>}, {pipeline_mode = #tpu.pipeline_mode<synchronous>, transform_indices = @transform_13, window_bounds = array<i64: 64, 128>}, {pipeline_mode = #tpu.pipeline_mode<synchronous>, transform_indices = @transform_14, window_bounds = array<i64: 1, 128>}, {pipeline_mode = #tpu.pipeline_mode<synchronous>, transform_indices = @transform_15, window_bounds = array<i64: 1, 128>}, {pipeline_mode = #tpu.pipeline_mode<synchronous>, transform_indices = @transform_16, window_bounds = array<i64: 1, 128>}, {pipeline_mode = #tpu.pipeline_mode<synchronous>, transform_indices = @transform_17, window_bounds = array<i64: 128, 32>}, {pipeline_mode = #tpu.pipeline_mode<synchronous>, transform_indices = @transform_18, window_bounds = array<i64: 1, 32>}, {pipeline_mode = #tpu.pipeline_mode<synchronous>, transform_indices = @transform_19, window_bounds = array<i64: 1, 32>}, {pipeline_mode = #tpu.pipeline_mode<synchronous>, transform_indices = @transform_20, window_bounds = array<i64: 1, 32>}, {pipeline_mode = #tpu.pipeline_mode<synchronous>, transform_indices = @transform_21, window_bounds = array<i64: 32, 16>}, {pipeline_mode = #tpu.pipeline_mode<synchronous>, transform_indices = @transform_22, window_bounds = array<i64: 1, 16>}, {transform_indices = @transform_23, window_bounds = array<i64: 1, 2, 16>}]} {
    %c0 = arith.constant 0 : index
    %c0_0 = arith.constant 0 : index
    %c0_1 = arith.constant 0 : index
    %0 = vector.load %arg1[%c0, %c0_0, %c0_1] : memref<1x8x8xf32, #tpu.memory_space<vmem>>, vector<1x8x8xf32>
    %1 = vector.shape_cast %0 : vector<1x8x8xf32> to vector<8x8xf32>
    %c0_2 = arith.constant 0 : index
    %c0_3 = arith.constant 0 : index
    %2 = vector.load %arg4[%c0_2, %c0_3] : memref<8x32xf32, #tpu.memory_space<vmem>>, vector<8x32xf32>
    %cst = arith.constant dense<0.000000e+00> : vector<8x32xf32>
    %3 = tpu.matmul %1, %2, %cst {dimension_numbers = #tpu.dot_dimension_numbers<[1], [0], [0], [1], [0, 0, 1, 1], [], []>} : vector<8x8xf32>, vector<8x32xf32>, vector<8x32xf32> -> vector<8x32xf32>
    %c0_4 = arith.constant 0 : index
    %c0_5 = arith.constant 0 : index
    %4 = vector.load %arg5[%c0_4, %c0_5] : memref<1x32xf32, #tpu.memory_space<vmem>>, vector<1x32xf32>
    %5 = vector.broadcast %4 : vector<1x32xf32> to vector<8x32xf32>
    %6 = arith.addf %3, %5 : vector<8x32xf32>
    %cst_6 = arith.constant 2.000000e-01 : f32
    %7 = vector.broadcast %cst_6 : f32 to vector<8x32xf32>
    %8 = arith.mulf %7, %6 : vector<8x32xf32>
    %9 = arith.maximumf %6, %8 : vector<8x32xf32>
    %c0_7 = arith.constant 0 : index
    %c0_8 = arith.constant 0 : index
    %c0_9 = arith.constant 0 : index
    %10 = vector.load %arg2[%c0_7, %c0_8, %c0_9] : memref<2x4x8xf32, #tpu.memory_space<vmem>>, vector<1x4x8xf32>
    %11 = vector.shape_cast %10 : vector<1x4x8xf32> to vector<4x8xf32>
    %cst_10 = arith.constant dense<0.000000e+00> : vector<4x32xf32>
    %12 = tpu.matmul %11, %9, %cst_10 {dimension_numbers = #tpu.dot_dimension_numbers<[1], [0], [0], [1], [0, 0, 1, 1], [], []>} : vector<4x8xf32>, vector<8x32xf32>, vector<4x32xf32> -> vector<4x32xf32>
    %c0_11 = arith.constant 0 : index
    %c0_12 = arith.constant 0 : index
    %c0_13 = arith.constant 0 : index
    %13 = vector.load %arg6[%c0_11, %c0_12, %c0_13] : memref<2x32x32xf32, #tpu.memory_space<vmem>>, vector<1x32x32xf32>
    %14 = vector.shape_cast %13 : vector<1x32x32xf32> to vector<32x32xf32>
    %cst_14 = arith.constant dense<0.000000e+00> : vector<4x32xf32>
    %15 = tpu.matmul %12, %14, %cst_14 {dimension_numbers = #tpu.dot_dimension_numbers<[1], [0], [0], [1], [0, 0, 1, 1], [], []>} : vector<4x32xf32>, vector<32x32xf32>, vector<4x32xf32> -> vector<4x32xf32>
    %c1 = arith.constant 1 : index
    %c0_15 = arith.constant 0 : index
    %c0_16 = arith.constant 0 : index
    %16 = vector.load %arg2[%c1, %c0_15, %c0_16] : memref<2x4x8xf32, #tpu.memory_space<vmem>>, vector<1x4x8xf32>
    %17 = vector.shape_cast %16 : vector<1x4x8xf32> to vector<4x8xf32>
    %cst_17 = arith.constant dense<0.000000e+00> : vector<4x32xf32>
    %18 = tpu.matmul %17, %9, %cst_17 {dimension_numbers = #tpu.dot_dimension_numbers<[1], [0], [0], [1], [0, 0, 1, 1], [], []>} : vector<4x8xf32>, vector<8x32xf32>, vector<4x32xf32> -> vector<4x32xf32>
    %c1_18 = arith.constant 1 : index
    %c0_19 = arith.constant 0 : index
    %c0_20 = arith.constant 0 : index
    %19 = vector.load %arg6[%c1_18, %c0_19, %c0_20] : memref<2x32x32xf32, #tpu.memory_space<vmem>>, vector<1x32x32xf32>
    %20 = vector.shape_cast %19 : vector<1x32x32xf32> to vector<32x32xf32>
    %cst_21 = arith.constant dense<0.000000e+00> : vector<4x32xf32>
    %21 = tpu.matmul %18, %20, %cst_21 {dimension_numbers = #tpu.dot_dimension_numbers<[1], [0], [0], [1], [0, 0, 1, 1], [], []>} : vector<4x32xf32>, vector<32x32xf32>, vector<4x32xf32> -> vector<4x32xf32>
    %22 = arith.addf %15, %21 : vector<4x32xf32>
    %c0_22 = arith.constant 0 : index
    %c0_23 = arith.constant 0 : index
    %23 = vector.load %arg7[%c0_22, %c0_23] : memref<1x32xf32, #tpu.memory_space<vmem>>, vector<1x32xf32>
    %24 = vector.broadcast %23 : vector<1x32xf32> to vector<4x32xf32>
    %25 = arith.addf %22, %24 : vector<4x32xf32>
    %c0_24 = arith.constant 0 : index
    %c0_25 = arith.constant 0 : index
    %26 = vector.load %arg8[%c0_24, %c0_25] : memref<1x32xf32, #tpu.memory_space<vmem>>, vector<1x32xf32>
    %27 = vector.broadcast %26 : vector<1x32xf32> to vector<4x32xf32>
    %28 = arith.mulf %25, %27 : vector<4x32xf32>
    %c0_26 = arith.constant 0 : index
    %c0_27 = arith.constant 0 : index
    %29 = vector.load %arg9[%c0_26, %c0_27] : memref<1x32xf32, #tpu.memory_space<vmem>>, vector<1x32xf32>
    %30 = vector.broadcast %29 : vector<1x32xf32> to vector<4x32xf32>
    %31 = arith.addf %28, %30 : vector<4x32xf32>
    %cst_28 = arith.constant 2.000000e-01 : f32
    %32 = vector.broadcast %cst_28 : f32 to vector<4x32xf32>
    %33 = arith.mulf %32, %31 : vector<4x32xf32>
    %34 = arith.maximumf %31, %33 : vector<4x32xf32>
    %c0_29 = arith.constant 0 : index
    %c0_30 = arith.constant 0 : index
    %c0_31 = arith.constant 0 : index
    %35 = vector.load %arg3[%c0_29, %c0_30, %c0_31] : memref<2x2x4xf32, #tpu.memory_space<vmem>>, vector<1x2x4xf32>
    %36 = vector.shape_cast %35 : vector<1x2x4xf32> to vector<2x4xf32>
    %cst_32 = arith.constant dense<0.000000e+00> : vector<2x32xf32>
    %37 = tpu.matmul %36, %34, %cst_32 {dimension_numbers = #tpu.dot_dimension_numbers<[1], [0], [0], [1], [0, 0, 1, 1], [], []>} : vector<2x4xf32>, vector<4x32xf32>, vector<2x32xf32> -> vector<2x32xf32>
    %c0_33 = arith.constant 0 : index
    %c0_34 = arith.constant 0 : index
    %c0_35 = arith.constant 0 : index
    %38 = vector.load %arg10[%c0_33, %c0_34, %c0_35] : memref<2x32x64xf32, #tpu.memory_space<vmem>>, vector<1x32x64xf32>
    %39 = vector.shape_cast %38 : vector<1x32x64xf32> to vector<32x64xf32>
    %cst_36 = arith.constant dense<0.000000e+00> : vector<2x64xf32>
    %40 = tpu.matmul %37, %39, %cst_36 {dimension_numbers = #tpu.dot_dimension_numbers<[1], [0], [0], [1], [0, 0, 1, 1], [], []>} : vector<2x32xf32>, vector<32x64xf32>, vector<2x64xf32> -> vector<2x64xf32>
    %c1_37 = arith.constant 1 : index
    %c0_38 = arith.constant 0 : index
    %c0_39 = arith.constant 0 : index
    %41 = vector.load %arg3[%c1_37, %c0_38, %c0_39] : memref<2x2x4xf32, #tpu.memory_space<vmem>>, vector<1x2x4xf32>
    %42 = vector.shape_cast %41 : vector<1x2x4xf32> to vector<2x4xf32>
    %cst_40 = arith.constant dense<0.000000e+00> : vector<2x32xf32>
    %43 = tpu.matmul %42, %34, %cst_40 {dimension_numbers = #tpu.dot_dimension_numbers<[1], [0], [0], [1], [0, 0, 1, 1], [], []>} : vector<2x4xf32>, vector<4x32xf32>, vector<2x32xf32> -> vector<2x32xf32>
    %c1_41 = arith.constant 1 : index
    %c0_42 = arith.constant 0 : index
    %c0_43 = arith.constant 0 : index
    %44 = vector.load %arg10[%c1_41, %c0_42, %c0_43] : memref<2x32x64xf32, #tpu.memory_space<vmem>>, vector<1x32x64xf32>
    %45 = vector.shape_cast %44 : vector<1x32x64xf32> to vector<32x64xf32>
    %cst_44 = arith.constant dense<0.000000e+00> : vector<2x64xf32>
    %46 = tpu.matmul %43, %45, %cst_44 {dimension_numbers = #tpu.dot_dimension_numbers<[1], [0], [0], [1], [0, 0, 1, 1], [], []>} : vector<2x32xf32>, vector<32x64xf32>, vector<2x64xf32> -> vector<2x64xf32>
    %47 = arith.addf %40, %46 : vector<2x64xf32>
    %c0_45 = arith.constant 0 : index
    %c0_46 = arith.constant 0 : index
    %48 = vector.load %arg11[%c0_45, %c0_46] : memref<1x64xf32, #tpu.memory_space<vmem>>, vector<1x64xf32>
    %49 = vector.broadcast %48 : vector<1x64xf32> to vector<2x64xf32>
    %50 = arith.addf %47, %49 : vector<2x64xf32>
    %c0_47 = arith.constant 0 : index
    %c0_48 = arith.constant 0 : index
    %51 = vector.load %arg12[%c0_47, %c0_48] : memref<1x64xf32, #tpu.memory_space<vmem>>, vector<1x64xf32>
    %52 = vector.broadcast %51 : vector<1x64xf32> to vector<2x64xf32>
    %53 = arith.mulf %50, %52 : vector<2x64xf32>
    %c0_49 = arith.constant 0 : index
    %c0_50 = arith.constant 0 : index
    %54 = vector.load %arg13[%c0_49, %c0_50] : memref<1x64xf32, #tpu.memory_space<vmem>>, vector<1x64xf32>
    %55 = vector.broadcast %54 : vector<1x64xf32> to vector<2x64xf32>
    %56 = arith.addf %53, %55 : vector<2x64xf32>
    %cst_51 = arith.constant 2.000000e-01 : f32
    %57 = vector.broadcast %cst_51 : f32 to vector<2x64xf32>
    %58 = arith.mulf %57, %56 : vector<2x64xf32>
    %59 = arith.maximumf %56, %58 : vector<2x64xf32>
    %c0_52 = arith.constant 0 : index
    %c0_53 = arith.constant 0 : index
    %60 = vector.load %arg14[%c0_52, %c0_53] : memref<64x128xf32, #tpu.memory_space<vmem>>, vector<64x128xf32>
    %cst_54 = arith.constant dense<0.000000e+00> : vector<2x128xf32>
    %61 = tpu.matmul %59, %60, %cst_54 {dimension_numbers = #tpu.dot_dimension_numbers<[1], [0], [0], [1], [0, 0, 1, 1], [], []>} : vector<2x64xf32>, vector<64x128xf32>, vector<2x128xf32> -> vector<2x128xf32>
    %c0_55 = arith.constant 0 : index
    %c0_56 = arith.constant 0 : index
    %62 = vector.load %arg15[%c0_55, %c0_56] : memref<1x128xf32, #tpu.memory_space<vmem>>, vector<1x128xf32>
    %63 = vector.broadcast %62 : vector<1x128xf32> to vector<2x128xf32>
    %64 = arith.addf %61, %63 : vector<2x128xf32>
    %c0_57 = arith.constant 0 : index
    %c0_58 = arith.constant 0 : index
    %65 = vector.load %arg16[%c0_57, %c0_58] : memref<1x128xf32, #tpu.memory_space<vmem>>, vector<1x128xf32>
    %66 = vector.broadcast %65 : vector<1x128xf32> to vector<2x128xf32>
    %67 = arith.mulf %64, %66 : vector<2x128xf32>
    %c0_59 = arith.constant 0 : index
    %c0_60 = arith.constant 0 : index
    %68 = vector.load %arg17[%c0_59, %c0_60] : memref<1x128xf32, #tpu.memory_space<vmem>>, vector<1x128xf32>
    %69 = vector.broadcast %68 : vector<1x128xf32> to vector<2x128xf32>
    %70 = arith.addf %67, %69 : vector<2x128xf32>
    %cst_61 = arith.constant 2.000000e-01 : f32
    %71 = vector.broadcast %cst_61 : f32 to vector<2x128xf32>
    %72 = arith.mulf %71, %70 : vector<2x128xf32>
    %73 = arith.maximumf %70, %72 : vector<2x128xf32>
    %c0_62 = arith.constant 0 : index
    %c0_63 = arith.constant 0 : index
    %74 = vector.load %arg18[%c0_62, %c0_63] : memref<128x32xf32, #tpu.memory_space<vmem>>, vector<128x32xf32>
    %cst_64 = arith.constant dense<0.000000e+00> : vector<2x32xf32>
    %75 = tpu.matmul %73, %74, %cst_64 {dimension_numbers = #tpu.dot_dimension_numbers<[1], [0], [0], [1], [0, 0, 1, 1], [], []>} : vector<2x128xf32>, vector<128x32xf32>, vector<2x32xf32> -> vector<2x32xf32>
    %c0_65 = arith.constant 0 : index
    %c0_66 = arith.constant 0 : index
    %76 = vector.load %arg19[%c0_65, %c0_66] : memref<1x32xf32, #tpu.memory_space<vmem>>, vector<1x32xf32>
    %77 = vector.broadcast %76 : vector<1x32xf32> to vector<2x32xf32>
    %78 = arith.addf %75, %77 : vector<2x32xf32>
    %c0_67 = arith.constant 0 : index
    %c0_68 = arith.constant 0 : index
    %79 = vector.load %arg20[%c0_67, %c0_68] : memref<1x32xf32, #tpu.memory_space<vmem>>, vector<1x32xf32>
    %80 = vector.broadcast %79 : vector<1x32xf32> to vector<2x32xf32>
    %81 = arith.mulf %78, %80 : vector<2x32xf32>
    %c0_69 = arith.constant 0 : index
    %c0_70 = arith.constant 0 : index
    %82 = vector.load %arg21[%c0_69, %c0_70] : memref<1x32xf32, #tpu.memory_space<vmem>>, vector<1x32xf32>
    %83 = vector.broadcast %82 : vector<1x32xf32> to vector<2x32xf32>
    %84 = arith.addf %81, %83 : vector<2x32xf32>
    %cst_71 = arith.constant 2.000000e-01 : f32
    %85 = vector.broadcast %cst_71 : f32 to vector<2x32xf32>
    %86 = arith.mulf %85, %84 : vector<2x32xf32>
    %87 = arith.maximumf %84, %86 : vector<2x32xf32>
    %c0_72 = arith.constant 0 : index
    %c0_73 = arith.constant 0 : index
    %88 = vector.load %arg22[%c0_72, %c0_73] : memref<32x16xf32, #tpu.memory_space<vmem>>, vector<32x16xf32>
    %cst_74 = arith.constant dense<0.000000e+00> : vector<2x16xf32>
    %89 = tpu.matmul %87, %88, %cst_74 {dimension_numbers = #tpu.dot_dimension_numbers<[1], [0], [0], [1], [0, 0, 1, 1], [], []>} : vector<2x32xf32>, vector<32x16xf32>, vector<2x16xf32> -> vector<2x16xf32>
    %c0_75 = arith.constant 0 : index
    %c0_76 = arith.constant 0 : index
    %90 = vector.load %arg23[%c0_75, %c0_76] : memref<1x16xf32, #tpu.memory_space<vmem>>, vector<1x16xf32>
    %91 = vector.broadcast %90 : vector<1x16xf32> to vector<2x16xf32>
    %92 = arith.addf %89, %91 : vector<2x16xf32>
    %cst_77 = arith.constant 0.000000e+00 : f32
    %93 = vector.broadcast %cst_77 : f32 to vector<2x16xf32>
    %94 = arith.subf %93, %92 : vector<2x16xf32>
    %95 = math.exp %94 : vector<2x16xf32>
    %cst_78 = arith.constant 1.000000e+00 : f32
    %96 = vector.broadcast %cst_78 : f32 to vector<2x16xf32>
    %97 = arith.addf %96, %95 : vector<2x16xf32>
    %cst_79 = arith.constant 1.000000e+00 : f32
    %98 = vector.broadcast %cst_79 : f32 to vector<2x16xf32>
    %99 = arith.divf %98, %97 : vector<2x16xf32>
    %c0_80 = arith.constant 0 : index
    %c0_81 = arith.constant 0 : index
    %c0_82 = arith.constant 0 : index
    %100 = vector.load %arg24[%c0_80, %c0_81, %c0_82] : memref<1x2x16xf32, #tpu.memory_space<vmem>>, vector<1x2x16xf32>
    %101 = vector.shape_cast %100 : vector<1x2x16xf32> to vector<2x16xf32>
    %102 = vector.shape_cast %99 : vector<2x16xf32> to vector<1x2x16xf32>
    tpu.vector_store %arg24[%c0_80, %c0_81, %c0_82], %102 {strides = array<i32>} : memref<1x2x16xf32, #tpu.memory_space<vmem>>, vector<1x2x16xf32>,
    return
  }
  func.func @transform_0(%arg0: i32) -> (i32, i32, i32) {
    %c0_i32 = arith.constant 0 : i32
    %c0_i32_0 = arith.constant 0 : i32
    %c0_i32_1 = arith.constant 0 : i32
    return %arg0, %c0_i32, %c0_i32_0 : i32, i32, i32
  }
  func.func @transform_1(%arg0: i32) -> (i32, i32, i32) {
    %c0_i32 = arith.constant 0 : i32
    %c0_i32_0 = arith.constant 0 : i32
    %c0_i32_1 = arith.constant 0 : i32
    %c0_i32_2 = arith.constant 0 : i32
    return %c0_i32, %c0_i32_0, %c0_i32_1 : i32, i32, i32
  }
  func.func @transform_2(%arg0: i32) -> (i32, i32, i32) {
    %c0_i32 = arith.constant 0 : i32
    %c0_i32_0 = arith.constant 0 : i32
    %c0_i32_1 = arith.constant 0 : i32
    %c0_i32_2 = arith.constant 0 : i32
    return %c0_i32, %c0_i32_0, %c0_i32_1 : i32, i32, i32
  }
  func.func @transform_3(%arg0: i32) -> (i32, i32) {
    %c0_i32 = arith.constant 0 : i32
    %c0_i32_0 = arith.constant 0 : i32
    %c0_i32_1 = arith.constant 0 : i32
    return %c0_i32, %c0_i32_0 : i32, i32
  }
  func.func @transform_4(%arg0: i32) -> (i32, i32) {
    %c0_i32 = arith.constant 0 : i32
    %c0_i32_0 = arith.constant 0 : i32
    %c0_i32_1 = arith.constant 0 : i32
    return %c0_i32, %c0_i32_0 : i32, i32
  }
  func.func @transform_5(%arg0: i32) -> (i32, i32, i32) {
    %c0_i32 = arith.constant 0 : i32
    %c0_i32_0 = arith.constant 0 : i32
    %c0_i32_1 = arith.constant 0 : i32
    %c0_i32_2 = arith.constant 0 : i32
    return %c0_i32, %c0_i32_0, %c0_i32_1 : i32, i32, i32
  }
  func.func @transform_6(%arg0: i32) -> (i32, i32) {
    %c0_i32 = arith.constant 0 : i32
    %c0_i32_0 = arith.constant 0 : i32
    %c0_i32_1 = arith.constant 0 : i32
    return %c0_i32, %c0_i32_0 : i32, i32
  }
  func.func @transform_7(%arg0: i32) -> (i32, i32) {
    %c0_i32 = arith.constant 0 : i32
    %c0_i32_0 = arith.constant 0 : i32
    %c0_i32_1 = arith.constant 0 : i32
    return %c0_i32, %c0_i32_0 : i32, i32
  }
  func.func @transform_8(%arg0: i32) -> (i32, i32) {
    %c0_i32 = arith.constant 0 : i32
    %c0_i32_0 = arith.constant 0 : i32
    %c0_i32_1 = arith.constant 0 : i32
    return %c0_i32, %c0_i32_0 : i32, i32
  }
  func.func @transform_9(%arg0: i32) -> (i32, i32, i32) {
    %c0_i32 = arith.constant 0 : i32
    %c0_i32_0 = arith.constant 0 : i32
    %c0_i32_1 = arith.constant 0 : i32
    %c0_i32_2 = arith.constant 0 : i32
    return %c0_i32, %c0_i32_0, %c0_i32_1 : i32, i32, i32
  }
  func.func @transform_10(%arg0: i32) -> (i32, i32) {
    %c0_i32 = arith.constant 0 : i32
    %c0_i32_0 = arith.constant 0 : i32
    %c0_i32_1 = arith.constant 0 : i32
    return %c0_i32, %c0_i32_0 : i32, i32
  }
  func.func @transform_11(%arg0: i32) -> (i32, i32) {
    %c0_i32 = arith.constant 0 : i32
    %c0_i32_0 = arith.constant 0 : i32
    %c0_i32_1 = arith.constant 0 : i32
    return %c0_i32, %c0_i32_0 : i32, i32
  }
  func.func @transform_12(%arg0: i32) -> (i32, i32) {
    %c0_i32 = arith.constant 0 : i32
    %c0_i32_0 = arith.constant 0 : i32
    %c0_i32_1 = arith.constant 0 : i32
    return %c0_i32, %c0_i32_0 : i32, i32
  }
  func.func @transform_13(%arg0: i32) -> (i32, i32) {
    %c0_i32 = arith.constant 0 : i32
    %c0_i32_0 = arith.constant 0 : i32
    %c0_i32_1 = arith.constant 0 : i32
    return %c0_i32, %c0_i32_0 : i32, i32
  }
  func.func @transform_14(%arg0: i32) -> (i32, i32) {
    %c0_i32 = arith.constant 0 : i32
    %c0_i32_0 = arith.constant 0 : i32
    %c0_i32_1 = arith.constant 0 : i32
    return %c0_i32, %c0_i32_0 : i32, i32
  }
  func.func @transform_15(%arg0: i32) -> (i32, i32) {
    %c0_i32 = arith.constant 0 : i32
    %c0_i32_0 = arith.constant 0 : i32
    %c0_i32_1 = arith.constant 0 : i32
    return %c0_i32, %c0_i32_0 : i32, i32
  }
  func.func @transform_16(%arg0: i32) -> (i32, i32) {
    %c0_i32 = arith.constant 0 : i32
    %c0_i32_0 = arith.constant 0 : i32
    %c0_i32_1 = arith.constant 0 : i32
    return %c0_i32, %c0_i32_0 : i32, i32
  }
  func.func @transform_17(%arg0: i32) -> (i32, i32) {
    %c0_i32 = arith.constant 0 : i32
    %c0_i32_0 = arith.constant 0 : i32
    %c0_i32_1 = arith.constant 0 : i32
    return %c0_i32, %c0_i32_0 : i32, i32
  }
  func.func @transform_18(%arg0: i32) -> (i32, i32) {
    %c0_i32 = arith.constant 0 : i32
    %c0_i32_0 = arith.constant 0 : i32
    %c0_i32_1 = arith.constant 0 : i32
    return %c0_i32, %c0_i32_0 : i32, i32
  }
  func.func @transform_19(%arg0: i32) -> (i32, i32) {
    %c0_i32 = arith.constant 0 : i32
    %c0_i32_0 = arith.constant 0 : i32
    %c0_i32_1 = arith.constant 0 : i32
    return %c0_i32, %c0_i32_0 : i32, i32
  }
  func.func @transform_20(%arg0: i32) -> (i32, i32) {
    %c0_i32 = arith.constant 0 : i32
    %c0_i32_0 = arith.constant 0 : i32
    %c0_i32_1 = arith.constant 0 : i32
    return %c0_i32, %c0_i32_0 : i32, i32
  }
  func.func @transform_21(%arg0: i32) -> (i32, i32) {
    %c0_i32 = arith.constant 0 : i32
    %c0_i32_0 = arith.constant 0 : i32
    %c0_i32_1 = arith.constant 0 : i32
    return %c0_i32, %c0_i32_0 : i32, i32
  }
  func.func @transform_22(%arg0: i32) -> (i32, i32) {
    %c0_i32 = arith.constant 0 : i32
    %c0_i32_0 = arith.constant 0 : i32
    %c0_i32_1 = arith.constant 0 : i32
    return %c0_i32, %c0_i32_0 : i32, i32
  }
  func.func @transform_23(%arg0: i32) -> (i32, i32, i32) {
    %c0_i32 = arith.constant 0 : i32
    %c0_i32_0 = arith.constant 0 : i32
    %c0_i32_1 = arith.constant 0 : i32
    return %arg0, %c0_i32, %c0_i32_0 : i32, i32, i32
  }
}

</mosaic_0001>

<bundles_post_ra>
// kernel: discriminator_forward.1
= control target key start
LH: loop header
LB: loop body
LE: loop exit
PB: predicated region body
PF: predicated region fallthrough
CT: control target
= control target key end

     0   :  { %s2730_s0 = inlined_call_operand.vmem [shape: f32[2,8,8], index: 0, kind: input, shape index: {}]   ;;  %s2731_s1 = inlined_call_operand.vmem [shape: f32[2,4,8], index: 1, kind: input, shape index: {}]   ;;  %s2732_s2 = inlined_call_operand.vmem [shape: f32[2,2,4], index: 2, kind: input, shape index: {}]   ;;  %s2733_s3 = inlined_call_operand.vmem [shape: f32[8,32], index: 3, kind: input, shape index: {}]   ;;  %s2734_s4 = inlined_call_operand.vmem [shape: f32[1,32], index: 4, kind: input, shape index: {}]   ;;  %s2735_s5 = inlined_call_operand.vmem [shape: f32[2,32,32], index: 5, kind: input, shape index: {}]   ;;  %s2736_s6 = inlined_call_operand.vmem [shape: f32[1,32], index: 6, kind: input, shape index: {}]   ;;  %s2737_s7 = inlined_call_operand.vmem [shape: f32[1,32], index: 7, kind: input, shape index: {}]   ;;  %s2738_s8 = inlined_call_operand.vmem [shape: f32[1,32], index: 8, kind: input, shape index: {}]   ;;  %s2739_s9 = inlined_call_operand.vmem [shape: f32[2,32,64], index: 9, kind: input, shape index: {}]   ;;  %s2740_s10 = inlined_call_operand.vmem [shape: f32[1,64], index: 10, kind: input, shape index: {}]   ;;  %s2741_s11 = inlined_call_operand.vmem [shape: f32[1,64], index: 11, kind: input, shape index: {}]   ;;  %s2742_s12 = inlined_call_operand.vmem [shape: f32[1,64], index: 12, kind: input, shape index: {}]   ;;  %s2743_s13 = inlined_call_operand.vmem [shape: f32[64,128], index: 13, kind: input, shape index: {}]   ;;  %s2744_s14 = inlined_call_operand.vmem [shape: f32[1,128], index: 14, kind: input, shape index: {}]   ;;  %s2745_s15 = inlined_call_operand.vmem [shape: f32[1,128], index: 15, kind: input, shape index: {}]   ;;  %s2746_s16 = inlined_call_operand.vmem [shape: f32[1,128], index: 16, kind: input, shape index: {}]   ;;  %s2747_s17 = inlined_call_operand.vmem [shape: f32[128,32], index: 17, kind: input, shape index: {}]   ;;  %s2748_s18 = inlined_call_operand.vmem [shape: f32[1,32], index: 18, kind: input, shape index: {}]   ;;  %s2749_s19 = inlined_call_operand.vmem [shape: f32[1,32], index: 19, kind: input, shape index: {}]   ;;  %s2750_s20 = inlined_call_operand.vmem [shape: f32[1,32], index: 20, kind: input, shape index: {}]   ;;  %s2751_s21 = inlined_call_operand.vmem [shape: f32[32,16], index: 21, kind: input, shape index: {}]   ;;  %s2752_s22 = inlined_call_operand.vmem [shape: f32[1,16], index: 22, kind: input, shape index: {}]   ;;  %s2753_s23 = inlined_call_operand.hbm [shape: f32[2,2,16], index: 23, kind: output, shape index: {}]  }
   0x1   :  { %2764 = sst [smem:[#allocation11_spill]] %s2730_s0 }
   0x2   :  { %2765 = sst [smem:[#allocation12_spill]] %s2731_s1 }
   0x3   :  { %2766 = sst [smem:[#allocation13_spill]] %s2732_s2 }
   0x4   :  { %2767 = sst [smem:[#allocation14_spill]] %s2733_s3 }
   0x5   :  { %2768 = sst [smem:[#allocation15_spill]] %s2734_s4 }
   0x6   :  { %2769 = sst [smem:[#allocation16_spill]] %s2735_s5 }
   0x7   :  { %2770 = sst [smem:[#allocation17_spill]] %s2736_s6 }
   0x8   :  { %2771 = sst [smem:[#allocation18_spill]] %s2737_s7 }
   0x9   :  { %2772 = sst [smem:[#allocation19_spill]] %s2738_s8 }
   0xa   :  { %2773 = sst [smem:[#allocation20_spill]] %s2739_s9 }
   0xb   :  { %2774 = sst [smem:[#allocation21_spill]] %s2753_s23 }
   0xc   :  { %28 = vsyncpa [#allocation3], 0 }
   0xd   :  { %30 = vsyncpa [#allocation3 + $0x1], 0  ;;  %s2382_s4 = smov 0   ;;  %s2384_s30 = smov 0  }
   0xe   :  { %s2386_s24 = smov 0   ;;  %s2388_s25 = smov 0  }
   0xf LB: > { %2775 = sst [smem:[#allocation5_spill]] %s2244_s4  ;;  %s2403_s5 = sadd.s32 4294967295, %s2256_s25   ;;  %s2256_s25 = sphi %s2388_s25, %s2798_s25   ;;  %s2252_s24 = sphi %s2386_s24, %s2800_s24   ;;  %s2248_s30 = sphi %s2384_s30, %s2802_s30   ;;  %s2244_s4 = sphi %s2382_s4, %s2801_s4  }
  0x10   : > { %2776 = sst [smem:[#allocation6_spill]] %s2252_s24  ;;  %s1840_s1 = sadd.s32 4294967294, %s2256_s25  }
  0x11   : > { %2777 = sst [smem:[#allocation7_spill]] %s2256_s25  ;;  %s2407_s26 = sadd.s32 1, %s2256_s25  }
  0x12   : > { %2778 = sst [smem:[#allocation8_spill]] %s2407_s26  ;;  %s531_s2 = sadd.s32 1, %s2252_s24 }
  0x13   : > { %s528_s6 = ssub.s32 %s2256_s25, %s2407_s26  ;;  %p541_p0 = scmp.ne.s32.totalorder %s2252_s24, %s2248_s30 }
  0x14   : > { %p529_p1 = scmp.eq.s32.totalorder %s528_s6, 0  ;;  %p542_p2 = scmp.eq.s32.totalorder %s2403_s5, 1 }
  0x15   : > { %p547_p3 = scmp.ne.s32.totalorder %s2248_s30, %s2244_s4  ;;  %p548_p4 = scmp.eq.s32.totalorder %s1840_s1, 1 }
  0x16   : > { %s2418_s27 = scalar_select %p529_p1, %s2252_s24, %s531_s2  }
  0x17   : > { %p2420_p5 = por %p542_p2, %p541_p0  ;;  %p2424_p6 = por %p548_p4, %p547_p3 }
  0x18   : > { %2779 = sst [smem:[#allocation9_spill]] %s2418_s27  ;;  %p1843_p7 = scmp.ge.s32.totalorder %s2256_s25, 1 }
  0x19   : > { %s2781_s28 = scalar_select %p2424_p6, 1, 0 }
  0x1a   : > { %p639_p8 = scmp.lt.s32.totalorder %s2256_s25, 3 }
  0x1b   : > { %2782 = sst [smem:[#allocation10_spill]] %s2781_s28 }
  0x1c   : > { %p640_p9 = pnand %p1843_p7, %p639_p8 }
  0x1d   : > { %s2783_s0 = sld [smem:[#allocation14_spill]] (!%p640_p9)  ;;  %p702_p10 = scmp.lt.s32.totalorder (!%p640_p9), %s2403_s5, 1  ;;  %v2258_v1 = vmov (!%p640_p9), 0.0   ;;  %vm2259_vm0 = vmmov (!%p640_p9), 0   ;;  %vm715_vm1 = vcmask (!%p640_p9), 64512   ;;  %v2260_v21 = vmov (!%p640_p9), 0.0|0.0  }
  0x1e   : > { %643 = sbr.rel (%p640_p9) target bundleno = 1834 (0x72a), region = 112  ;;  %1948 = vmatprep.subr.mxu1 (!%p640_p9), %v2258_v1  ;;  %1950 = vmatprep.mubr.msk.f32.mxu1 (!%p640_p9), %vm2259_vm0, %v2258_v1  ;;  %s2784_s3 = sld [smem:[#allocation11_spill]] (!%p640_p9)  ;;  %vm949_vm2 = vcmask (!%p640_p9), 261120   ;;  %vm1127_vm3 = vcmask (!%p640_p9), 1043456   ;;  %vm1123_vm4 = vcmask (!%p640_p9), 31744   ;;  %v1457_v55 = vld [vmem:[%s2743_s13] sm:$0xff] (!%p640_p9) }
  0x1f   : > { %1958 = vmatprep.subr.mxu0 (!%p640_p9), %v2258_v1  ;;  %1960 = vmatprep.mubr.msk.f32.mxu0 (!%p640_p9), %vm2259_vm0, %v2258_v1  ;;  %s2785_s26 = sld [smem:[#allocation15_spill]] (!%p640_p9)  ;;  %s2786_s4 = sld [smem:[#allocation16_spill]] (!%p640_p9)  ;;  %v1458_v56 = vld [vmem:[%s2743_s13 + $0x8] sm:$0xff] (!%p640_p9)  ;;  %v1459_v62 = vld [vmem:[%s2743_s13 + $0x10] sm:$0xff] (!%p640_p9)  ;;  %v1460_v63 = vld [vmem:[%s2743_s13 + $0x18] sm:$0xff] (!%p640_p9)  ;;  %vm1472_vm5 = vcmask (!%p640_p9), 523264  }
  0x20   : > { %s2788_s27 = sld [smem:[#allocation12_spill]] (!%p640_p9)  ;;  %s2791_s8 = sld [smem:[#allocation19_spill]] (!%p640_p9)  ;;  %v2107_v57 = vpack.c.bf16 (!%p640_p9), %v1458_v56, %v1457_v55  ;;  %v1675_v55 = vld [vmem:[%s2751_s21] sm:$0xff] (!%p640_p9)  ;;  %v1676_v56 = vld [vmem:[%s2751_s21 + $0x8] sm:$0xff] (!%p640_p9)  ;;  %vm1765_vm6 = vcmask (!%p640_p9), 123904  }
  0x21   : > { %s2792_s9 = sld [smem:[#allocation20_spill]] (!%p640_p9)  ;;  %s2793_s29 = sld [smem:[#allocation13_spill]] (!%p640_p9) }
  0x23   : > { %v707_v0 = vld [vmem:[%s2783_s0] sm:$0xff] (!%p640_p9) }
  0x24   : > { %1949 = vmatpush3.msra.mxu1 (!%p640_p9), %v707_v0  ;;  %v2110_v0 = vpack.c.bf16 (!%p640_p9), %v1460_v63, %v1459_v62  ;;  %v1879_v63 = vld [vmem:[%s2749_s19] ss:$0 sm:$0xff] (!%p640_p9) }
  0x25   : > { %s703_s1 = scalar_select %p702_p10, %s2403_s5, 1  ;;  %1953 = vmatprep.subr.mxu1 %v2258_v1  ;;  %v1846_v3 = vld [vmem:[%s2785_s26] ss:$0 sm:$0xff] }
  0x26   : > { %s2787_s23 = smov %s2786_s4  ;;  %v1851_v7 = vld [vmem:[%s2786_s4 + $0x20] sm:$0xff]  ;;  %s2789_s4 = sld [smem:[#allocation17_spill]] }
  0x27   : > { %s1845_s2 = sshll.u32 %s703_s1, 3  ;;  %v1852_v9 = vld [vmem:[%s2787_s23 + $0x28] sm:$0xff]  ;;  %v865_v10 = vld [vmem:[%s2787_s23] sm:$0xff]  ;;  %v1853_v17 = vld [vmem:[%s2787_s23 + $0x30] sm:$0xff]  ;;  %s699_s1 = sand.u32 1, %s2248_s30  }
  0x28   : > { %s705_s0 = scalar_lea.vmem %s2784_s3, %s1845_s2  ;;  %v866_v11 = vld [vmem:[%s2787_s23 + $0x8] sm:$0xff]  ;;  %v791_v13 = vld [vmem:[%s2788_s27] sm:$0xf]  ;;  %v1849_v14 = vld [vmem:[%s2788_s27 + $0x4] sm:$0xf]  ;;  %v2083_v15 = vpack.c.bf16 %v1852_v9, %v1851_v7  ;;  %s2790_s2 = sld [smem:[#allocation18_spill]] }
  0x29   : > { %v706_v2 = vld [vmem:[%s705_s0] sm:$0xff]  ;;  %v2089_v16 = vpack.c.bf16 %v866_v11, %v865_v10  ;;  %v1854_v18 = vld [vmem:[%s2787_s23 + $0x38] sm:$0xff]  ;;  %v867_v19 = vld [vmem:[%s2787_s23 + $0x10] sm:$0xff]  ;;  %s1844_s6 = sshll.u32 %s699_s1, 1  ;;  %s2794_s26 = sld [smem:[#allocation21_spill]] }
  0x2a   : > { %1951 = vmatmul.mubr.msk.f32.vlgmr.msra.gmra.mrb[0].mxu1 %vm715_vm1, %v706_v2  ;;  %v868_v20 = vld [vmem:[%s2787_s23 + $0x18] sm:$0xff]  ;;  %v2086_v22 = vpack.c.bf16 %v1854_v18, %v1853_v17  ;;  %v1859_v36 = vld [vmem:[%s2791_s8] ss:$0 sm:$0xff]  ;;  %v1866_v41 = vld [vmem:[%s2792_s9 + $0x28] sm:$0xff]  ;;  %s701_s25 = scalar_lea.vmem [#allocation2], %s1844_s6 }
  0x2b   : > { %1955 = vmatprep.mubr.msk.f32.mxu1 %vm2259_vm0, %v2258_v1  ;;  %v2092_v23 = vpack.c.bf16 %v868_v20, %v867_v19  ;;  %v1865_v39 = vld [vmem:[%s2792_s9 + $0x20] sm:$0xff]  ;;  %v1202_v43 = vld [vmem:[%s2792_s9 + $0x8] sm:$0xff]  ;;  %v1867_v49 = vld [vmem:[%s2792_s9 + $0x30] sm:$0xff]  ;;  %s1781_s3 = sshll.u32 %s701_s25, 4  ;;  %s2690_s3 = int_to_ptr.vmem [resolvable:$true] %s1781_s3 }
  0x2c   : > { %v1857_v30 = vld [vmem:[%s2789_s4] ss:$0 sm:$0xff]  ;;  %v1862_v46 = vld [vmem:[%s2793_s29 + $0x2] sm:$0x3]  ;;  %v2095_v47 = vpack.c.bf16 %v1866_v41, %v1865_v39  ;;  %v1868_v50 = vld [vmem:[%s2792_s9 + $0x38] sm:$0xff]  ;;  %s1768_s4 = scalar_lea.sflag [#allocation3], %s699_s1 }
  0x2d   : > { %v1201_v42 = vld [vmem:[%s2792_s9] sm:$0xff]  ;;  %v1203_v51 = vld [vmem:[%s2792_s9 + $0x10] sm:$0xff]  ;;  %v1204_v52 = vld [vmem:[%s2792_s9 + $0x18] sm:$0xff]  ;;  %v2098_v53 = vpack.c.bf16 %v1868_v50, %v1867_v49  ;;  %s2194_s8 = scalar_lea.vmem %s2690_s3, 32 }
  0x2e   : > { %v1858_v34 = vld [vmem:[%s2790_s2] ss:$0 sm:$0xff]  ;;  %v2101_v48 = vpack.c.bf16 %v1202_v43, %v1201_v42  ;;  %v2104_v54 = vpack.c.bf16 %v1204_v52, %v1203_v51  ;;  %v1565_v9 = vld [vmem:[%s2747_s17 + $0x8] sm:$0xff]  ;;  %v1566_v10 = vld [vmem:[%s2747_s17 + $0x10] sm:$0xff]  ;;  %s1884_s2 = sshll.u32 %s2403_s5, 5  ;;  %p2195_p11 = scmp.ne.s32.totalorder %s2690_s3, %s2194_s8 }
  0x2f   : > { %v1122_v45 = vld [vmem:[%s2793_s29] sm:$0x3]  ;;  %v1570_v17 = vld [vmem:[%s2747_s17 + $0x30] sm:$0xff]  ;;  %v1571_v18 = vld [vmem:[%s2747_s17 + $0x38] sm:$0xff]  ;;  %s2688_s28 = scalar_lea.hbm %s2794_s26, %s1884_s2  ;;  %s2261_s5 = smov [#allocation2]  }
  0x30   : > { %v1461_v2 = vld [vmem:[%s2743_s13 + $0x20] sm:$0xff]  ;;  %v2128_v19 = vpack.c.bf16 %v1571_v18, %v1570_v17  ;;  %v1578_v42 = vld [vmem:[%s2747_s17 + $0x70] sm:$0xff]  ;;  %v1579_v43 = vld [vmem:[%s2747_s17 + $0x78] sm:$0xff]  ;;  %p2196_p12 = pnand %p2195_p11, %p2420_p5  ;;  %s2198_s6 = sshll.u32 %s2261_s5, 4  ;;  %s2199_s6 = int_to_ptr.vmem [resolvable:$false] %s2198_s6 }
  0x31   : > { %v1572_v20 = vld [vmem:[%s2747_s17 + $0x40] sm:$0xff]  ;;  %s2200_s9 = scalar_lea.vmem %s2199_s6, 64  ;;  %p2201_p0 = scmp.lt.s32.totalorder %s2690_s3, %s2199_s6 }
  0x32   : > { %v1877_v50 = vld [vmem:[%s2746_s16] ss:$0 sm:$0xff]  ;;  %p2197_p13 = pneg %p2196_p12  ;;  %p2202_p1 = scmp.lt.s32.totalorder %s2200_s9, %s2194_s8 }
  0x34   : > { %p2203_p2 = por %p2202_p1, %p2201_p0 }
  0x36   : > { %p2204_p3 = pnand %p2203_p2, %p2197_p13 }
  0xfd   : > { %v785_v4 = vpop.f32.mrb[0].mxu1 }
  0xfe   : > { %v786_v5 = vadd.f32 %v1846_v3, %v785_v4  ;;  %v1952_v6 = vpop.f32.mrb[1].mxu1  ;;  %v1462_v3 = vld [vmem:[%s2743_s13 + $0x28] sm:$0xff] }
  0xff   : > { %v2113_v4 = vpack.c.bf16 %v1462_v3, %v1461_v2  ;;  %v1464_v6 = vld [vmem:[%s2743_s13 + $0x38] sm:$0xff]  ;;  %v1880_v2 = vld [vmem:[%s2750_s20] ss:$0 sm:$0xff] }
 0x100   : > { %v789_v8 = vmul.f32 0.2, %v786_v5 }
 0x102   : > { %v790_v12 = vmax.f32 %v786_v5, %v789_v8  ;;  %v1463_v5 = vld [vmem:[%s2743_s13 + $0x30] sm:$0xff]  ;;  %v1564_v8 = vld [vmem:[%s2747_s17] sm:$0xff] }
 0x103   : > { %v2116_v7 = vpack.c.bf16 %v1464_v6, %v1463_v5  ;;  %v2119_v11 = vpack.c.bf16 %v1565_v9, %v1564_v8 }
 0x104   : > { %1954 = vmatpush3.msra.mxu1 %v790_v12  ;;  %1959 = vmatpush3.msra.mxu0 %v790_v12  ;;  %v1567_v12 = vld [vmem:[%s2747_s17 + $0x18] sm:$0xff] }
 0x105   : > { %1956 = vmatmul.mubr.msk.f32.vlgmr.msra.gmra.mrb[2].mxu1 %vm715_vm1, %v791_v13  ;;  %1961 = vmatmul.mubr.msk.f32.vlgmr.msra.gmra.mrb[0].mxu0 %vm715_vm1, %v1849_v14  ;;  %v2122_v13 = vpack.c.bf16 %v1567_v12, %v1566_v10  ;;  %v1568_v14 = vld [vmem:[%s2747_s17 + $0x20] sm:$0xff] }
 0x106   : > { %2082 = vmatprep.subr.bf16.mxu1 %v2260_v21  ;;  %2088 = vmatprep.subr.bf16.mxu0 %v2260_v21 }
 0x107   : > { %2084 = vmatpush3.bf16.msra.mxu1 %v2083_v15  ;;  %2090 = vmatpush3.bf16.msra.mxu0 %v2089_v16  ;;  %v1569_v15 = vld [vmem:[%s2747_s17 + $0x28] sm:$0xff] }
 0x108   : > { %2085 = vmatprep.subr.bf16.mxu1 %v2260_v21  ;;  %2091 = vmatprep.subr.bf16.mxu0 %v2260_v21  ;;  %v2125_v16 = vpack.c.bf16 %v1569_v15, %v1568_v14 }
 0x109   : > { %1971 = vmatprep.mubr.msk.f32.mxu1 %vm2259_vm0, %v2258_v1  ;;  %1982 = vmatprep.mubr.msk.f32.mxu0 %vm2259_vm0, %v2258_v1 }
 0x10b   : > { %2087 = vmatpush3.bf16.msra.mxu1 %v2086_v22  ;;  %2093 = vmatpush3.bf16.msra.mxu0 %v2092_v23  ;;  %v1573_v22 = vld [vmem:[%s2747_s17 + $0x48] sm:$0xff] }
 0x10c   : > { %1985 = vmatprep.subr.mxu1 %v2258_v1  ;;  %1990 = vmatprep.subr.mxu0 %v2258_v1  ;;  %v2131_v23 = vpack.c.bf16 %v1573_v22, %v1572_v20 }
 0x1d8   : > { %v861_v24 = vpop.f32.mrb[2].mxu1  ;;  %v940_v25 = vpop.f32.mrb[0].mxu0 }
 0x1d9   : > { %v1957_v26 = vpop.f32.mrb[3].mxu1  ;;  %v1962_v27 = vpop.f32.mrb[1].mxu0  ;;  %1972 = vmatmul.mubr.msk.f32.vlgmr.msra.gmra.mrb[4].mxu1 %vm949_vm2, %v940_v25  ;;  %1983 = vmatmul.mubr.msk.f32.vlgmr.msra.gmra.mrb[2].mxu0 %vm949_vm2, %v861_v24 }
 0x1da   : > { %1987 = vmatprep.mubr.msk.f32.mxu1 %vm2259_vm0, %v2258_v1  ;;  %1992 = vmatprep.mubr.msk.f32.mxu0 %vm2259_vm0, %v2258_v1  ;;  %v1871_v26 = vld [vmem:[%s2740_s10] ss:$0 sm:$0xff] }
 0x2ac   : > { %v1019_v28 = vpop.f32.mrb[4].mxu1  ;;  %v1092_v29 = vpop.f32.mrb[2].mxu0 }
 0x2ad   : > { %v1093_v31 = vadd.f32 %v1092_v29, %v1019_v28  ;;  %v1973_v32 = vpop.f32.mrb[5].mxu1  ;;  %v1984_v33 = vpop.f32.mrb[3].mxu0 }
 0x2ae   : > { %v1873_v32 = vld [vmem:[%s2742_s12] ss:$0 sm:$0xff] }
 0x2af   : > { %v1103_v35 = vadd.f32 %v1857_v30, %v1093_v31  ;;  %v1872_v30 = vld [vmem:[%s2741_s11] ss:$0 sm:$0xff] }
 0x2b1   : > { %v1111_v37 = vmul.f32 %v1858_v34, %v1103_v35 }
 0x2b3   : > { %v1119_v38 = vadd.f32 %v1859_v36, %v1111_v37  ;;  %v1574_v37 = vld [vmem:[%s2747_s17 + $0x50] sm:$0xff] }
 0x2b5   : > { %v1120_v40 = vmul.f32 0.2, %v1119_v38 }
 0x2b7   : > { %v1121_v44 = vmax.f32 %v1119_v38, %v1120_v40  ;;  %v1575_v38 = vld [vmem:[%s2747_s17 + $0x58] sm:$0xff]  ;;  %v1576_v40 = vld [vmem:[%s2747_s17 + $0x60] sm:$0xff] }
 0x2b8   : > { %v2134_v39 = vpack.c.bf16 %v1575_v38, %v1574_v37 }
 0x2b9   : > { %1986 = vmatpush3.msk.msra.mxu1 %vm1127_vm3, %v1121_v44  ;;  %1991 = vmatpush3.msk.msra.mxu0 %vm1127_vm3, %v1121_v44  ;;  %v2140_v44 = vpack.c.bf16 %v1579_v43, %v1578_v42 }
 0x2ba   : > { %1988 = vmatmul.mubr.msk.f32.vlgmr.msra.gmra.mrb[6].mxu1 %vm1123_vm4, %v1122_v45  ;;  %1993 = vmatmul.mubr.msk.f32.vlgmr.msra.gmra.mrb[4].mxu0 %vm1123_vm4, %v1862_v46  ;;  %v1874_v45 = vld [vmem:[%s2744_s14] ss:$0 sm:$0xff] }
 0x2bb   : > { %2094 = vmatprep.subr.bf16.mxu1 %v2260_v21  ;;  %2100 = vmatprep.subr.bf16.mxu0 %v2260_v21 }
 0x2bc   : > { %2096 = vmatpush3.bf16.msra.mxu1 %v2095_v47  ;;  %2102 = vmatpush3.bf16.msra.mxu0 %v2101_v48  ;;  %v1876_v47 = vld [vmem:[%s2745_s15] ss:$0 sm:$0xff] }
 0x2bd   : > { %2097 = vmatprep.subr.bf16.mxu1 %v2260_v21  ;;  %2103 = vmatprep.subr.bf16.mxu0 %v2260_v21 }
 0x2be   : > { %2003 = vmatprep.mubr.msk.f32.mxu1 %vm2259_vm0, %v2258_v1  ;;  %2014 = vmatprep.mubr.msk.f32.mxu0 %vm2259_vm0, %v2258_v1 }
 0x2c0   : > { %2099 = vmatpush3.bf16.msra.mxu1 %v2098_v53  ;;  %2105 = vmatpush3.bf16.msra.mxu0 %v2104_v54 }
 0x2c1   : > { %2106 = vmatprep.subr.bf16.mxu1 %v2260_v21  ;;  %2118 = vmatprep.subr.bf16.mxu0 %v2260_v21 }
 0x38d   : > { %v1197_v58 = vpop.f32.mrb[6].mxu1  ;;  %v1276_v59 = vpop.f32.mrb[4].mxu0 }
 0x38e   : > { %2004 = vmatmul.mubr.msk.f32.vlgmr.msra.gmra.mrb[8].mxu1 %vm949_vm2, %v1276_v59  ;;  %2015 = vmatmul.mubr.msk.f32.vlgmr.msra.gmra.mrb[6].mxu0 %vm949_vm2, %v1197_v58  ;;  %v1989_v60 = vpop.f32.mrb[7].mxu1  ;;  %v1994_v61 = vpop.f32.mrb[5].mxu0  ;;  %v1677_v58 = vld [vmem:[%s2751_s21 + $0x10] sm:$0xff]  ;;  %v1678_v59 = vld [vmem:[%s2751_s21 + $0x18] sm:$0xff] }
 0x38f   : > { %2108 = vmatpush3.bf16.msra.mxu1 %v2107_v57  ;;  %2033 = vmatprep.mubr.msk.f32.mxu1 %vm2259_vm0, %v2258_v1  ;;  %v2143_v57 = vpack.c.bf16 %v1676_v56, %v1675_v55  ;;  %v2146_v60 = vpack.c.bf16 %v1678_v59, %v1677_v58  ;;  %v1878_v61 = vld [vmem:[%s2748_s18] ss:$0 sm:$0xff] }
 0x390   : > { %2109 = vmatprep.subr.bf16.mxu1 %v2260_v21  ;;  %2068 = vmatprep.mubr.msk.f32.mxu0 %vm2259_vm0, %v2258_v1 }
 0x391   : > { %2120 = vmatpush3.bf16.msra.mxu0 %v2119_v11 }
 0x392   : > { %2121 = vmatprep.subr.bf16.mxu0 %v2260_v21 }
 0x393   : > { %2111 = vmatpush3.bf16.msra.mxu1 %v2110_v0 }
 0x394   : > { %2112 = vmatprep.subr.bf16.mxu1 %v2260_v21 }
 0x395   : > { %2123 = vmatpush3.bf16.msra.mxu0 %v2122_v13 }
 0x396   : > { %2124 = vmatprep.subr.bf16.mxu0 %v2260_v21 }
 0x397   : > { %2114 = vmatpush3.bf16.msra.mxu1 %v2113_v4 }
 0x398   : > { %2115 = vmatprep.subr.bf16.mxu1 %v2260_v21 }
 0x399   : > { %2126 = vmatpush3.bf16.msra.mxu0 %v2125_v16 }
 0x39a   : > { %2127 = vmatprep.subr.bf16.mxu0 %v2260_v21 }
 0x39b   : > { %2117 = vmatpush3.bf16.msra.mxu1 %v2116_v7  ;;  %v1881_v7 = vld [vmem:[%s2752_s22] ss:$0 sm:$0xff] }
 0x39c   : > { %2142 = vmatprep.subr.bf16.mxu1 %v2260_v21 }
 0x39d   : > { %2129 = vmatpush3.bf16.msra.mxu0 %v2128_v19 }
 0x39e   : > { %2130 = vmatprep.subr.bf16.mxu0 %v2260_v21 }
 0x3a1   : > { %2132 = vmatpush3.bf16.msra.mxu0 %v2131_v23 }
 0x3a2   : > { %2133 = vmatprep.subr.bf16.mxu0 %v2260_v21 }
 0x3a5   : > { %2135 = vmatpush3.bf16.msra.mxu0 %v2134_v39 }
 0x3a6   : > { %2136 = vmatprep.subr.bf16.mxu0 %v2260_v21 }
 0x461   : > { %v1354_v24 = vpop.f32.mrb[8].mxu1  ;;  %v1427_v25 = vpop.f32.mrb[6].mxu0 }
 0x462   : > { %v1428_v27 = vadd.f32 %v1427_v25, %v1354_v24  ;;  %v2005_v28 = vpop.f32.mrb[9].mxu1  ;;  %v2016_v29 = vpop.f32.mrb[7].mxu0 }
 0x464   : > { %v1438_v31 = vadd.f32 %v1871_v26, %v1428_v27 }
 0x466   : > { %v1446_v33 = vmul.f32 %v1872_v30, %v1438_v31 }
 0x468   : > { %v1454_v34 = vadd.f32 %v1873_v32, %v1446_v33 }
 0x46a   : > { %v1455_v35 = vmul.f32 0.2, %v1454_v34 }
 0x46c   : > { %v1456_v36 = vmax.f32 %v1454_v34, %v1455_v35 }
 0x46e   : > { %2034 = vmatmul.mubr.msk.f32.vlgmr.msra.gmra.mrb[10].mxu1 %vm1472_vm5, %v1456_v36 }
 0x46f   : > { %2079 = vmatprep.mubr.msk.f32.mxu1 %vm2259_vm0, %v2258_v1  ;;  %v1577_v1 = vld [vmem:[%s2747_s17 + $0x68] sm:$0xff]  ;;  %2144 = vmatpush3.bf16.msra.mxu1 %v2143_v57 }
 0x470   : > { %v2137_v41 = vpack.c.bf16 %v1577_v1, %v1576_v40  ;;  %2145 = vmatprep.subr.bf16.mxu1 %v2260_v21 }
 0x472   : > { %2138 = vmatpush3.bf16.msra.mxu0 %v2137_v41 }
 0x473   : > { %2139 = vmatprep.subr.bf16.mxu0 %v2260_v21  ;;  %2147 = vmatpush3.bf16.msra.mxu1 %v2146_v60 }
 0x476   : > { %2141 = vmatpush3.bf16.msra.mxu0 %v2140_v44 }
 0x541   : > { %v1542_v46 = vpop.f32.mrb[10].mxu1 }
 0x542   : > { %v1543_v48 = vadd.f32 %v1874_v45, %v1542_v46  ;;  %v2035_v49 = vpop.f32.mrb[11].mxu1 }
 0x544   : > { %v1553_v51 = vmul.f32 %v1876_v47, %v1543_v48 }
 0x546   : > { %v1561_v52 = vadd.f32 %v1877_v50, %v1553_v51 }
 0x548   : > { %v1562_v53 = vmul.f32 0.2, %v1561_v52 }
 0x54a   : > { %v1563_v54 = vmax.f32 %v1561_v52, %v1562_v53 }
 0x54c   : > { %2069 = vmatmul.mubr.f32.vlgmr.msra.gmra.mrb[8].mxu0 %v1563_v54 }
 0x61f   : > { %v1653_v62 = vpop.f32.mrb[8].mxu0 }
 0x620   : > { %v1654_v21 = vadd.f32 %v1878_v61, %v1653_v62  ;;  %v2070_v0 = vpop.f32.mrb[9].mxu0 }
 0x622   : > { %v1664_v3 = vmul.f32 %v1879_v63, %v1654_v21 }
 0x624   : > { %v1672_v4 = vadd.f32 %v1880_v2, %v1664_v3 }
 0x626   : > { %v1673_v5 = vmul.f32 0.2, %v1672_v4 }
 0x628   : > { %v1674_v6 = vmax.f32 %v1672_v4, %v1673_v5 }
 0x62a   : > { %2080 = vmatmul.mubr.msk.f32.vlgmr.msra.gmra.mrb[12].mxu1 %vm949_vm2, %v1674_v6 }
 0x6fd   : > { %v1755_v8 = vpop.f32.mrb[12].mxu1 }
 0x6fe   : > { %v1756_v9 = vadd.f32 %v1881_v7, %v1755_v8  ;;  %v2081_v10 = vpop.f32.mrb[13].mxu1 }
 0x700   : > { %v1759_v11 = vsub.f32 0.0, %v1756_v9 }
 0x702   : > { %v1760_v12 = vmul.f32 1.442695, %v1759_v11 }
 0x704   : > { %2190 = vpow2.f32 %v1760_v12 }
 0x70e   : > { %v2191_v13 = vpop.eup %2190 }
 0x70f   : > { %v1762_v14 = vadd.f32 1.0, %v2191_v13 }
 0x711   : > { %2192 = vrcp.f32 %v1762_v14 }
 0x71b   : > { %v2193_v15 = vpop.eup %2192 }
 0x71c   : > { %1766 = vst.msk [vmem:[%s701_s25] sm:$0x3] %vm1765_vm6, %v2193_v15 }
 0x71d   : > { %2207 = shalt.err (!%p2204_p3)
}
 0x71e   : > { %s2208_s1 = scalar_lea.hbm %s2688_s28, 32  ;;  %s2212_s0 = scalar_lea.hbm %s2794_s26, 64 }
 0x71f   : > { %p2209_p4 = scmp.ne.s32.totalorder %s2688_s28, %s2208_s1  ;;  %p2213_p9 = scmp.lt.u32.totalorder %s2688_s28, %s2794_s26 }
 0x720   : > { %p2214_p10 = scmp.lt.u32.totalorder %s2212_s0, %s2208_s1  ;;  %p2216_p12 = scmp.lt.u32.totalorder %s2208_s1, %s2688_s28 }
 0x721   : > { %p2210_p7 = pnand %p2209_p4, %p2420_p5 }
 0x722   : > { %p2215_p11 = por %p2214_p10, %p2213_p9 }
 0x723   : > { %p2211_p8 = pneg %p2210_p7 }
 0x724   : > { %p2217_p13 = por %p2216_p12, %p2215_p11 }
 0x726   : > { %p2218_p0 = pnand %p2217_p13, %p2211_p8 }
 0x728   : > { %2221 = shalt.err (!%p2218_p0)
}
 0x729   : > { %2148 = dma.vmem_to_hbm [thread:$0]  (%p2420_p5), %s2690_s3, 32, %s2688_s28, %s1768_s4  }
 0x72a PF: > { %s2795_s8 = sld [smem:[#allocation7_spill]]  ;;  %s2796_s9 = sld [smem:[#allocation5_spill]] }
 0x730   : > { %p2154_p1 = scmp.ge.s32.totalorder %s2795_s8, 2  ;;  %s1793_s2 = sand.u32 1, %s2796_s9  }
 0x731   : > { %s1794_s25 = scalar_lea.sflag [#allocation3], %s1793_s2 }
 0x732   : > { %p2151_p2 = pnand %p2154_p1, %p2424_p6 }
 0x734   : > { %2239 = dma.done.wait (!%p2151_p2), %s1794_s25, 32  }
 0x735   : > { %2241 = vsyncadd (!%p2151_p2), %s1794_s25, 4294967264  ;;  %s2798_s25 = sld [smem:[#allocation8_spill]]  ;;  %s2799_s1 = sld [smem:[#allocation6_spill]] }
 0x736   : > { %s2800_s24 = sld [smem:[#allocation9_spill]]  ;;  %s2801_s4 = smov %s2248_s30 }
 0x73b   : > { %p33_p3 = scmp.ge.s32.totalorder %s2798_s25, 4   ;;  %s2802_s30 = smov %s2799_s1 }
 0x73d   :  { %35 = sbr.rel (!%p33_p3) target bundleno = 15 (0xf), region = 151 }
 0x744   :  { %1799 = vsyncpa [#allocation3], 1 }
 0x745   :  { %1801 = vsyncpa [#allocation3 + $0x1], 1 }

</bundles_post_ra>
